<compile_context>
chip_gen: v5e
topology: v5e:2x2
jax: 0.10.0
libtpu: 0.0.40
codegen_flags: <defaults>
</compile_context>

<pallas_src>
import numpy as np

import jax
import jax.numpy as jnp
from jax.experimental import pallas as pl
from jax.experimental.pallas import tpu as pltpu


def _round_up(x, m):
    return -(-x // m) * m


def _vmem_params():
    """Generation-aware (tile budget, scoped vmem limit) in bytes."""
    try:
        cap = int(getattr(pltpu.get_tpu_info(), "vmem_capacity_bytes", 64 << 20))
    except Exception:  # pragma: no cover - conservative fallback
        cap = 64 << 20
    if cap >= (100 << 20):            # v5e / v6e: 128 MiB physical VMEM
        return 40 << 20, 96 << 20
    return 20 << 20, 48 << 20          # v7x-class: 64 MiB per TensorCore


def _pick_batch_block(b, t_pad, f3, f4, budget_bytes, max_tb=None):
    """Largest batch-block whose (double-buffered inputs + f32 temporaries)
    footprint fits the VMEM budget.  Does NOT need to divide B."""
    lanes = lambda n: _round_up(n, 128)
    per_batch = (
        2 * t_pad * (lanes(f3) + lanes(f4)) * 4   # double-buffered pred / gt4 tiles
        + 2 * 8 * 128 * 4                         # double-buffered (TB,1,1) mask tile
        + t_pad * 4 * 8 * 128                     # rough bound on f32 temporaries
    )
    fixed = 2 << 20                               # selection matrices, output, headroom
    cap = max(1, (budget_bytes - fixed) // per_batch)
    tb = int(min(cap, b, 512))
    if max_tb is not None:
        tb = min(tb, int(max_tb))
    return max(tb, 1)


def _make_kernel(gh, tb, tp, f3, f4):
    rows = tb * tp

    def kernel(blk_ref, run_ref, pred_ref, gt4_ref, mask_ref,
               sxyz_ref, sce_ref, out_ref):
        g = pl.program_id(1)
        step = pl.program_id(0) * gh + g

        @pl.when(g == 0)
        def _init():
            out_ref[...] = jnp.zeros_like(out_ref)

        @pl.when(run_ref[step] != 0)
        def _accumulate():
            # Per-batch validity (zero-padded in the wrapper for ragged tails),
            # applied with where so undefined tail data can never reach the sum.
            ok = mask_ref[...] > 0.0                                     # (TB,1,1)
            p4 = jnp.where(ok, pred_ref[...].astype(jnp.float32), 0.0)   # (TB,Tp,F3)
            g4 = jnp.where(ok, gt4_ref[...].astype(jnp.float32), 0.0)    # (TB,Tp,F4)

            # velocity w.r.t. frame 0 (t == 0 rows are exactly zero and are
            # harmless: the denominator uses T-1).
            pvel = (p4 - p4[:, 0:1, :]).reshape(rows, f3)
            gvel4 = (g4 - g4[:, 0:1, :]).reshape(rows, f4)
            g4flat = g4.reshape(rows, f4)

            # De-interleave the gt xyz channels into pred's stride-3 layout via
            # a constant 0/1 selection matrix on the MXU.  HIGHEST precision
            # keeps the copied values exact in f32.
            gvel = jnp.dot(gvel4, sxyz_ref[...],
                           preferred_element_type=jnp.float32,
                           precision=jax.lax.Precision.HIGHEST)           # (rows,F3)
            # Extract the confidence channel and broadcast it over xyz in one
            # matmul (weights only -> default single-pass precision is plenty).
            confx = jnp.dot(g4flat, sce_ref[...],
                            preferred_element_type=jnp.float32)           # (rows,F3)

            d = pvel - gvel
            out_ref[...] += jnp.sum(confx * d * d)

    return kernel


def vel_loss(pred_joints, gt_joints, dshape, has_3d, valid,
             joint_weight=5.0, max_batch_block=None):
    """JAX/Pallas port of Vel_Loss.forward.

    pred_joints : reshapeable to (B, T, A, J, 3)
    gt_joints   : reshapeable to (B, T, A, J, 4)   (last channel = confidence)
    dshape      : (B, T, A) static python ints
    has_3d      : unused (signature parity with the PyTorch module)
    valid       : reshapeable to (B, T, A)
    """
    del has_3d  # unused by the reference forward as well
    B, T, A = int(dshape[0]), int(dshape[1]), int(dshape[2])

    def _as_compute_dtype(x):
        x = jnp.asarray(x)
        if x.dtype in (jnp.bfloat16, jnp.float16, jnp.float32):
            return x                      # stream narrow dtypes as-is
        return x.astype(jnp.float32)

    pred = _as_compute_dtype(pred_joints).reshape(B, T, A, -1, 3)
    gt4 = _as_compute_dtype(gt_joints).reshape(B, T, A, -1, 4)
    J = pred.shape[3]
    AJ = A * J
    F3 = 3 * AJ
    F4 = 4 * AJ

    # ---- batch validity (matches: valid.sum(2).sum(1)/valid.shape[0] == 1) ----
    valid_r = jnp.asarray(valid, jnp.float32).reshape(B, T, A)
    v = valid_r.sum(axis=2).sum(axis=1) / jnp.float32(B)
    mask = (v == 1.0).astype(jnp.float32)                        # (B,)
    n_sel = mask.sum()

    if T < 2:
        # TODO(synk): with T == 1 the PyTorch reference takes the mean of an
        # empty tensor (NaN in torch); we return 0.0 instead.
        return {"vel_loss": jnp.float32(0.0)}

    # ---- flat views fed straight to the kernel (pure reshapes, no copy) ------
    pred_f = pred.reshape(B, T, F3)
    gt4_f = gt4.reshape(B, T, F4)

    # Pad T to a sublane multiple so the in-kernel (TB,T,.)->(TB*T,.) reshape is
    # layout-trivial.  Zero-padded frames carry conf == 0 -> contribute 0.
    Tp = _round_up(T, 8)
    if Tp != T:
        pad = ((0, 0), (0, Tp - T), (0, 0))
        pred_f = jnp.pad(pred_f, pad)
        gt4_f = jnp.pad(gt4_f, pad)

    budget, vmem_limit = _vmem_params()
    TB = _pick_batch_block(B, Tp, F3, F4, budget, max_batch_block)
    NBLK = -(-B // TB)               # cdiv: TB does not have to divide B
    GH = -(-NBLK // 2)               # inner steps per parallel index (>= 1)
    NS = 2 * GH                      # total grid steps

    # Per-batch mask padded to whole blocks, so ragged-tail reads are neutral.
    mask_pad = jnp.zeros((NBLK * TB,), jnp.float32).at[:B].set(mask)
    mask_arr = mask_pad.reshape(NBLK * TB, 1, 1)

    # Per-step metadata: which block to fetch and whether to accumulate.
    # Fully-invalid blocks (and padding steps) re-use the previously fetched
    # block index so their input DMAs are elided, and are skipped via run == 0.
    blk_has = mask_pad.reshape(NBLK, TB).max(axis=1) > 0.0       # (NBLK,)
    step_has = jnp.zeros((NS,), bool).at[:NBLK].set(blk_has)     # (NS,)
    natural = jnp.arange(NS, dtype=jnp.int32)
    cand = jnp.where(step_has, natural, jnp.int32(-1))
    blkmap = jnp.maximum(jax.lax.cummax(cand, axis=0), 0).astype(jnp.int32)
    runmap = step_has.astype(jnp.int32)

    # Constant 0/1 selection matrices:
    #   sxyz : (F4, F3)  gt4 stride-4 xyz  ->  pred-layout stride-3 xyz
    #   sce  : (F4, F3)  gt4 conf channel  ->  conf broadcast over xyz
    sxyz_np = np.zeros((F4, F3), np.float32)
    sce_np = np.zeros((F4, F3), np.float32)
    for j in range(AJ):
        for c in range(3):
            sxyz_np[4 * j + c, 3 * j + c] = 1.0
            sce_np[4 * j + 3, 3 * j + c] = 1.0
    sxyz = jnp.asarray(sxyz_np)
    sce = jnp.asarray(sce_np)

    data_map = lambda p, g, blk, run: (blk[p * GH + g], 0, 0)
    const_map = lambda p, g, blk, run: (0, 0)

    grid_spec = pltpu.PrefetchScalarGridSpec(
        num_scalar_prefetch=2,
        grid=(2, GH),
        in_specs=[
            pl.BlockSpec((TB, Tp, F3), data_map),   # pred
            pl.BlockSpec((TB, Tp, F4), data_map),   # raw gt (xyz + conf)
            pl.BlockSpec((TB, 1, 1), data_map),     # per-batch validity mask
            pl.BlockSpec((F4, F3), const_map),      # sxyz (fetched once)
            pl.BlockSpec((F4, F3), const_map),      # sce  (fetched once)
        ],
        out_specs=pl.BlockSpec((1, 8, 128), lambda p, g, blk, run: (p, 0, 0)),
    )

    kernel = _make_kernel(GH, TB, Tp, F3, F4)
    partial = pl.pallas_call(
        kernel,
        out_shape=jax.ShapeDtypeStruct((2, 8, 128), jnp.float32),
        grid_spec=grid_spec,
        compiler_params=pltpu.CompilerParams(
            dimension_semantics=("parallel", "arbitrary"),
            vmem_limit_bytes=vmem_limit),
    )(blkmap, runmap, pred_f, gt4_f, mask_arr, sxyz, sce)

    loss_sum = partial[:, 0, 0].sum()                 # add the two per-core partials
    denom = n_sel * jnp.float32((T - 1) * F3)
    loss = jnp.where(n_sel > 0, loss_sum / jnp.maximum(denom, 1.0), 0.0)
    return {"vel_loss": loss * jnp.float32(joint_weight)}


def _vel_loss_reference(pred_joints, gt_joints, dshape, valid, joint_weight=5.0):
    """Pure-JAX reference mirroring the PyTorch forward (for verification)."""
    B, T, A = dshape
    pred = jnp.asarray(pred_joints, jnp.float32).reshape(B, T, A, -1, 3)
    gt4 = jnp.asarray(gt_joints, jnp.float32).reshape(B, T, A, -1, 4)
    valid_r = jnp.asarray(valid, jnp.float32).reshape(B, T, A)
    v = valid_r.sum(axis=2).sum(axis=1) / jnp.float32(B)
    mask = (v == 1.0)

    conf = gt4[..., -1:][:, 1:]                                   # (B, T-1, A, J, 1)
    gt = gt4[..., :-1]
    pred_vel = pred[:, 1:] - pred[:, :1]
    gt_vel = gt[:, 1:] - gt[:, :1]
    per_elem = conf * (pred_vel - gt_vel) ** 2                    # (B, T-1, A, J, 3)

    n_sel = mask.sum()
    m = mask.astype(jnp.float32)[:, None, None, None, None]
    total = jnp.sum(m * per_elem)
    denom = n_sel.astype(jnp.float32) * jnp.float32(per_elem[0].size)
    loss = jnp.where(n_sel > 0, total / jnp.maximum(denom, 1.0), 0.0)
    return loss * jnp.float32(joint_weight)


if __name__ == "__main__":
    key = jax.random.PRNGKey(0)
    k = jax.random.split(key, 9)

    # ---- test 1: B=2, one valid batch, single block --------------------------
    B, T, A, J = 2, 8, 2, 14
    dshape = (B, T, A)
    pred1 = jax.random.normal(k[0], (B, T, A, J, 3), jnp.float32)
    gt1 = jnp.concatenate(
        [jax.random.normal(k[1], (B, T, A, J, 3), jnp.float32),
         jax.random.uniform(k[2], (B, T, A, J, 1), jnp.float32)], axis=-1)
    valid1 = jnp.zeros((B, T, A), jnp.float32)
    valid1 = valid1.at[0, 0, 0].set(1.0).at[0, 0, 1].set(1.0)   # batch 0 selected
    has_3d1 = jnp.ones((B * T * A,), jnp.float32)

    got1 = jax.block_until_ready(
        vel_loss(pred1, gt1, dshape, has_3d1, valid1)["vel_loss"])
    ref1 = jax.block_until_ready(_vel_loss_reference(pred1, gt1, dshape, valid1))
    assert jnp.allclose(got1, ref1, rtol=2e-3, atol=1e-6), (got1, ref1)

    # ---- test 2: B=7 (ragged tail), TB forced to 2 -> 4 blocks over the 2-way
    # parallel grid; block {2,3} is fully invalid (DMA elided + compute skipped)
    B2, T2, A2, J2 = 7, 8, 2, 14
    dshape2 = (B2, T2, A2)
    pred2 = jax.random.normal(k[3], (B2, T2, A2, J2, 3), jnp.float32)
    gt2 = jnp.concatenate(
        [jax.random.normal(k[4], (B2, T2, A2, J2, 3), jnp.float32),
         jax.random.uniform(k[5], (B2, T2, A2, J2, 1), jnp.float32)], axis=-1)
    valid2 = jnp.zeros((B2, T2, A2), jnp.float32)
    for b in (1, 4, 5, 6):                         # selected batches
        valid2 = valid2.at[b, 0:7, 0].set(1.0)     # per-batch sum == B2 == 7
    has_3d2 = jnp.ones((B2 * T2 * A2,), jnp.float32)

    got2 = jax.block_until_ready(
        vel_loss(pred2, gt2, dshape2, has_3d2, valid2,
                 max_batch_block=2)["vel_loss"])
    ref2 = jax.block_until_ready(_vel_loss_reference(pred2, gt2, dshape2, valid2))
    assert jnp.allclose(got2, ref2, rtol=2e-3, atol=1e-6), (got2, ref2)

    # ---- test 3: T not a multiple of 8 (exercises the wrapper T padding) -----
    B3, T3, A3, J3 = 4, 12, 1, 14
    dshape3 = (B3, T3, A3)
    pred3 = jax.random.normal(k[6], (B3, T3, A3, J3, 3), jnp.float32)
    gt3 = jnp.concatenate(
        [jax.random.normal(k[7], (B3, T3, A3, J3, 3), jnp.float32),
         jax.random.uniform(k[8], (B3, T3, A3, J3, 1), jnp.float32)], axis=-1)
    valid3 = jnp.zeros((B3, T3, A3), jnp.float32)
    for b in range(B3):
        valid3 = valid3.at[b, 0:4, 0].set(1.0)     # per-batch sum == B3 == 4
    has_3d3 = jnp.ones((B3 * T3 * A3,), jnp.float32)

    got3 = jax.block_until_ready(
        vel_loss(pred3, gt3, dshape3, has_3d3, valid3)["vel_loss"])
    ref3 = jax.block_until_ready(_vel_loss_reference(pred3, gt3, dshape3, valid3))
    assert jnp.allclose(got3, ref3, rtol=2e-3, atol=1e-6), (got3, ref3)

    print("KERNEL_OK")
</pallas_src>

<mosaic_0001>
module attributes {stable_mosaic.version = 11 : i64} {
  func.func @kernel(%arg0: i32, %arg1: i32, %arg2: memref<2xi32, #tpu.memory_space<smem>>, %arg3: memref<2xi32, #tpu.memory_space<smem>>, %arg4: memref<2x8x84xf32, #tpu.memory_space<vmem>>, %arg5: memref<2x8x112xf32, #tpu.memory_space<vmem>>, %arg6: memref<2x1x1xf32, #tpu.memory_space<vmem>>, %arg7: memref<112x84xf32, #tpu.memory_space<vmem>>, %arg8: memref<112x84xf32, #tpu.memory_space<vmem>>, %arg9: memref<1x8x128xf32, #tpu.memory_space<vmem>>) attributes {dimension_semantics = [#tpu.dimension_semantics<parallel>, #tpu.dimension_semantics<arbitrary>], iteration_bounds = array<i64: 2, 1>, scalar_prefetch = 2 : i64, scratch_operands = 0 : i64, tpu.core_type = #tpu.core_type<tc>, window_params = [{transform_indices = @transform_0, window_bounds = array<i64: 2, 8, 84>}, {transform_indices = @transform_1, window_bounds = array<i64: 2, 8, 112>}, {transform_indices = @transform_2, window_bounds = array<i64: 2, 1, 1>}, {pipeline_mode = #tpu.pipeline_mode<synchronous>, transform_indices = @transform_3, window_bounds = array<i64: 112, 84>}, {pipeline_mode = #tpu.pipeline_mode<synchronous>, transform_indices = @transform_4, window_bounds = array<i64: 112, 84>}, {transform_indices = @transform_5, window_bounds = array<i64: 1, 8, 128>}]} {
    %c1_i32 = arith.constant 1 : i32
    %0 = arith.muli %arg0, %c1_i32 : i32
    %1 = arith.addi %0, %arg1 : i32
    %c0_i32 = arith.constant 0 : i32
    %2 = arith.cmpi eq, %arg1, %c0_i32 : i32
    %3 = arith.extui %2 : i1 to i32
    %c0_i32_0 = arith.constant 0 : i32
    %4 = arith.cmpi ne, %3, %c0_i32_0 : i32
    scf.if %4 {
      %cst = arith.constant 0.000000e+00 : f32
      %10 = vector.broadcast %cst : f32 to vector<1x8x128xf32>
      %c0 = arith.constant 0 : index
      %c0_3 = arith.constant 0 : index
      %c0_4 = arith.constant 0 : index
      %11 = vector.load %arg9[%c0, %c0_3, %c0_4] : memref<1x8x128xf32, #tpu.memory_space<vmem>>, vector<1x8x128xf32>
      tpu.vector_store %arg9[%c0, %c0_3, %c0_4], %10 {strides = array<i32>} : memref<1x8x128xf32, #tpu.memory_space<vmem>>, vector<1x8x128xf32>,
    } else {
    }
    %5 = arith.index_cast %1 : i32 to index
    %6 = memref.load %arg3[%5] : memref<2xi32, #tpu.memory_space<smem>>
    %c0_i32_1 = arith.constant 0 : i32
    %7 = arith.cmpi ne, %6, %c0_i32_1 : i32
    %8 = arith.extui %7 : i1 to i32
    %c0_i32_2 = arith.constant 0 : i32
    %9 = arith.cmpi ne, %8, %c0_i32_2 : i32
    scf.if %9 {
      %c0 = arith.constant 0 : index
      %c0_3 = arith.constant 0 : index
      %c0_4 = arith.constant 0 : index
      %10 = vector.load %arg6[%c0, %c0_3, %c0_4] : memref<2x1x1xf32, #tpu.memory_space<vmem>>, vector<2x1x1xf32>
      %cst = arith.constant 0.000000e+00 : f32
      %11 = vector.broadcast %cst : f32 to vector<2x1x1xf32>
      %12 = arith.cmpf ogt, %10, %11 : vector<2x1x1xf32>
      %c0_5 = arith.constant 0 : index
      %c0_6 = arith.constant 0 : index
      %c0_7 = arith.constant 0 : index
      %13 = vector.load %arg4[%c0_5, %c0_6, %c0_7] : memref<2x8x84xf32, #tpu.memory_space<vmem>>, vector<2x8x84xf32>
      %cst_8 = arith.constant 0.000000e+00 : f32
      %14 = vector.shape_cast %12 : vector<2x1x1xi1> to vector<2x1x1xi1>
      %15 = vector.broadcast %14 : vector<2x1x1xi1> to vector<2x8x84xi1>
      %16 = vector.broadcast %cst_8 : f32 to vector<2x8x84xf32>
      %17 = arith.select %15, %13, %16 : vector<2x8x84xi1>, vector<2x8x84xf32>
      %c0_9 = arith.constant 0 : index
      %c0_10 = arith.constant 0 : index
      %c0_11 = arith.constant 0 : index
      %18 = vector.load %arg5[%c0_9, %c0_10, %c0_11] : memref<2x8x112xf32, #tpu.memory_space<vmem>>, vector<2x8x112xf32>
      %cst_12 = arith.constant 0.000000e+00 : f32
      %19 = vector.shape_cast %12 : vector<2x1x1xi1> to vector<2x1x1xi1>
      %20 = vector.broadcast %19 : vector<2x1x1xi1> to vector<2x8x112xi1>
      %21 = vector.broadcast %cst_12 : f32 to vector<2x8x112xf32>
      %22 = arith.select %20, %18, %21 : vector<2x8x112xi1>, vector<2x8x112xf32>
      %23 = vector.extract_strided_slice %17 {offsets = [0, 0, 0], sizes = [2, 1, 84], strides = [1, 1, 1]} : vector<2x8x84xf32> to vector<2x1x84xf32>
      %24 = vector.broadcast %23 : vector<2x1x84xf32> to vector<2x8x84xf32>
      %25 = arith.subf %17, %24 : vector<2x8x84xf32>
      %26 = vector.shape_cast %25 : vector<2x8x84xf32> to vector<16x84xf32>
      %27 = vector.extract_strided_slice %22 {offsets = [0, 0, 0], sizes = [2, 1, 112], strides = [1, 1, 1]} : vector<2x8x112xf32> to vector<2x1x112xf32>
      %28 = vector.broadcast %27 : vector<2x1x112xf32> to vector<2x8x112xf32>
      %29 = arith.subf %22, %28 : vector<2x8x112xf32>
      %30 = vector.shape_cast %29 : vector<2x8x112xf32> to vector<16x112xf32>
      %31 = vector.shape_cast %22 : vector<2x8x112xf32> to vector<16x112xf32>
      %c0_13 = arith.constant 0 : index
      %c0_14 = arith.constant 0 : index
      %32 = vector.load %arg7[%c0_13, %c0_14] : memref<112x84xf32, #tpu.memory_space<vmem>>, vector<112x84xf32>
      %cst_15 = arith.constant dense<0.000000e+00> : vector<16x84xf32>
      %33 = tpu.matmul %30, %32, %cst_15 {dimension_numbers = #tpu.dot_dimension_numbers<[1], [0], [0], [1], [0, 0, 1, 1], [], []>, precision = #tpu.contract_precision<fp32>} : vector<16x112xf32>, vector<112x84xf32>, vector<16x84xf32> -> vector<16x84xf32>
      %c0_16 = arith.constant 0 : index
      %c0_17 = arith.constant 0 : index
      %34 = vector.load %arg8[%c0_16, %c0_17] : memref<112x84xf32, #tpu.memory_space<vmem>>, vector<112x84xf32>
      %cst_18 = arith.constant dense<0.000000e+00> : vector<16x84xf32>
      %35 = tpu.matmul %31, %34, %cst_18 {dimension_numbers = #tpu.dot_dimension_numbers<[1], [0], [0], [1], [0, 0, 1, 1], [], []>} : vector<16x112xf32>, vector<112x84xf32>, vector<16x84xf32> -> vector<16x84xf32>
      %36 = arith.subf %26, %33 : vector<16x84xf32>
      %c0_19 = arith.constant 0 : index
      %c0_20 = arith.constant 0 : index
      %c0_21 = arith.constant 0 : index
      %37 = vector.load %arg9[%c0_19, %c0_20, %c0_21] : memref<1x8x128xf32, #tpu.memory_space<vmem>>, vector<1x8x128xf32>
      %38 = arith.mulf %35, %36 : vector<16x84xf32>
      %39 = arith.mulf %38, %36 : vector<16x84xf32>
      %40 = vector.shape_cast %39 : vector<16x84xf32> to vector<1x16x84xf32>
      %cst_22 = arith.constant dense<0.000000e+00> : vector<1xf32>
      %41 = vector.multi_reduction <add>, %40, %cst_22 [1, 2] : vector<1x16x84xf32> to vector<1xf32>
      %42 = vector.shape_cast %41 : vector<1xf32> to vector<1x1x1xf32>
      %43 = vector.extract %42[0, 0, 0] : f32 from vector<1x1x1xf32>
      %44 = vector.broadcast %43 : f32 to vector<1x8x128xf32>
      %45 = arith.addf %37, %44 : vector<1x8x128xf32>
      %c0_23 = arith.constant 0 : index
      %c0_24 = arith.constant 0 : index
      %c0_25 = arith.constant 0 : index
      %46 = vector.load %arg9[%c0_23, %c0_24, %c0_25] : memref<1x8x128xf32, #tpu.memory_space<vmem>>, vector<1x8x128xf32>
      tpu.vector_store %arg9[%c0_23, %c0_24, %c0_25], %45 {strides = array<i32>} : memref<1x8x128xf32, #tpu.memory_space<vmem>>, vector<1x8x128xf32>,
    } else {
    }
    return
  }
  func.func @transform_0(%arg0: i32, %arg1: i32, %arg2: memref<2xi32, #tpu.memory_space<smem>>, %arg3: memref<2xi32, #tpu.memory_space<smem>>) -> (i32, i32, i32) {
    %c1_i32 = arith.constant 1 : i32
    %0 = arith.muli %arg0, %c1_i32 : i32
    %1 = arith.addi %0, %arg1 : i32
    %2 = arith.index_cast %1 : i32 to index
    %3 = memref.load %arg2[%2] : memref<2xi32, #tpu.memory_space<smem>>
    %c0_i32 = arith.constant 0 : i32
    %c0_i32_0 = arith.constant 0 : i32
    %c0_i32_1 = arith.constant 0 : i32
    return %3, %c0_i32, %c0_i32_0 : i32, i32, i32
  }
  func.func @transform_1(%arg0: i32, %arg1: i32, %arg2: memref<2xi32, #tpu.memory_space<smem>>, %arg3: memref<2xi32, #tpu.memory_space<smem>>) -> (i32, i32, i32) {
    %c1_i32 = arith.constant 1 : i32
    %0 = arith.muli %arg0, %c1_i32 : i32
    %1 = arith.addi %0, %arg1 : i32
    %2 = arith.index_cast %1 : i32 to index
    %3 = memref.load %arg2[%2] : memref<2xi32, #tpu.memory_space<smem>>
    %c0_i32 = arith.constant 0 : i32
    %c0_i32_0 = arith.constant 0 : i32
    %c0_i32_1 = arith.constant 0 : i32
    return %3, %c0_i32, %c0_i32_0 : i32, i32, i32
  }
  func.func @transform_2(%arg0: i32, %arg1: i32, %arg2: memref<2xi32, #tpu.memory_space<smem>>, %arg3: memref<2xi32, #tpu.memory_space<smem>>) -> (i32, i32, i32) {
    %c1_i32 = arith.constant 1 : i32
    %0 = arith.muli %arg0, %c1_i32 : i32
    %1 = arith.addi %0, %arg1 : i32
    %2 = arith.index_cast %1 : i32 to index
    %3 = memref.load %arg2[%2] : memref<2xi32, #tpu.memory_space<smem>>
    %c0_i32 = arith.constant 0 : i32
    %c0_i32_0 = arith.constant 0 : i32
    %c0_i32_1 = arith.constant 0 : i32
    return %3, %c0_i32, %c0_i32_0 : i32, i32, i32
  }
  func.func @transform_3(%arg0: i32, %arg1: i32, %arg2: memref<2xi32, #tpu.memory_space<smem>>, %arg3: memref<2xi32, #tpu.memory_space<smem>>) -> (i32, i32) {
    %c0_i32 = arith.constant 0 : i32
    %c0_i32_0 = arith.constant 0 : i32
    %c0_i32_1 = arith.constant 0 : i32
    return %c0_i32, %c0_i32_0 : i32, i32
  }
  func.func @transform_4(%arg0: i32, %arg1: i32, %arg2: memref<2xi32, #tpu.memory_space<smem>>, %arg3: memref<2xi32, #tpu.memory_space<smem>>) -> (i32, i32) {
    %c0_i32 = arith.constant 0 : i32
    %c0_i32_0 = arith.constant 0 : i32
    %c0_i32_1 = arith.constant 0 : i32
    return %c0_i32, %c0_i32_0 : i32, i32
  }
  func.func @transform_5(%arg0: i32, %arg1: i32, %arg2: memref<2xi32, #tpu.memory_space<smem>>, %arg3: memref<2xi32, #tpu.memory_space<smem>>) -> (i32, i32, i32) {
    %c0_i32 = arith.constant 0 : i32
    %c0_i32_0 = arith.constant 0 : i32
    %c0_i32_1 = arith.constant 0 : i32
    return %arg0, %c0_i32, %c0_i32_0 : i32, i32, i32
  }
}

</mosaic_0001>

<bundles_post_ra>
// kernel: tpu_custom_call.1
= control target key start
LH: loop header
LB: loop body
LE: loop exit
PB: predicated region body
PF: predicated region fallthrough
CT: control target
= control target key end

     0   :  { %s1115_s30 = smov [#allocation3]   ;;  %s1116_s8 = smov [#allocation4]   ;;  %s1529_s0 = inlined_call_operand.vmem [shape: s32[2], index: 0, kind: input, shape index: {}]   ;;  %s1530_s2 = inlined_call_operand.vmem [shape: f32[2,8,84], index: 2, kind: input, shape index: {}]   ;;  %s1531_s3 = inlined_call_operand.vmem [shape: f32[2,8,112], index: 3, kind: input, shape index: {}]   ;;  %s1532_s4 = inlined_call_operand.vmem [shape: f32[2,1,1], index: 4, kind: input, shape index: {}]   ;;  %s1533_s5 = inlined_call_operand.vmem [shape: f32[112,84], index: 5, kind: input, shape index: {}]   ;;  %s1534_s6 = inlined_call_operand.vmem [shape: f32[112,84], index: 6, kind: input, shape index: {}]   ;;  %s1535_s7 = inlined_call_operand.hbm [shape: f32[2,8,128], index: 7, kind: output, shape index: {}]   ;;  %s1536_s1 = inlined_call_operand.vmem [shape: s32[2], index: 1, kind: input, shape index: {}]  }
   0x1   :  { %s13_s26 = sshll.u32 %s1529_s0, 4  ;;  %s18_s29 = sshll.u32 %s1536_s1, 4  ;;  %s14_s26 = int_to_ptr.vmem [resolvable:$true] %s13_s26  ;;  %s19_s29 = int_to_ptr.vmem [resolvable:$true] %s18_s29 }
   0x2   :  { %16 = dma.vmem_to_smem %s14_s26, 16, %s1115_s30, [#allocation2] }
   0x3   :  { %21 = dma.vmem_to_smem %s19_s29, 16, %s1116_s8, [#allocation2] }
   0x4   :  { %1085 = dma.done.wait [#allocation2], 32 }
   0x5   :  { %1086 = vsyncadd [#allocation2], 4294967264 }
   0x6   :  { %24 = sfence }
   0x7   :  { %25 = vsyncpa [#allocation6], 0 }
   0x8   :  { %27 = vsyncpa [#allocation6 + $0x1], 0  ;;  %s1165_s9 = smov 0   ;;  %s1167_s10 = smov 0  }
   0x9   :  { %s1169_s0 = smov 0   ;;  %s1171_s11 = smov 0  }
   0xa   :  { %s1173_s1 = smov 0   ;;  %s1175_s12 = smov 0  }
   0xb LB: > { %1540 = sst [smem:[#allocation9_spill]] %s1109_s1  ;;  %s915_s13 = sadd.s32 4294967295, %s1113_s12   ;;  %s1113_s12 = sphi %s1175_s12, %s33_s12   ;;  %s1109_s1 = sphi %s1173_s1, %s1546_s1   ;;  %s1105_s11 = sphi %s1171_s11, %s1545_s11   ;;  %s1101_s0 = sphi %s1169_s0, %s1549_s0   ;;  %s1097_s10 = sphi %s1167_s10, %s1548_s10   ;;  %s1093_s9 = sphi %s1165_s9, %s1547_s9  }
   0xc   : > { %s916_s14 = sadd.s32 4294967294, %s1113_s12   ;;  %s45_s15 = sadd.s32 1, %s1109_s1 }
   0xd   : > { %s184_s16 = sadd.s32 1, %s1101_s0  ;;  %p47_p0 = scmp.ge.s32.totalorder %s45_s15, 2 }
   0xe   : > { %p194_p1 = scmp.ne.s32.totalorder %s1101_s0, %s1097_s10  ;;  %p195_p2 = scmp.eq.s32.totalorder %s915_s13, 1 }
   0xf   : > { %p200_p3 = scmp.ne.s32.totalorder %s1097_s10, %s1093_s9  ;;  %s1551_s15 = smov (%p47_p0, %s45_s15), 0 }
  0x10   : > { %1541 = sst [smem:[#allocation10_spill]] %s1551_s15  ;;  %p1205_p4 = por %p195_p2, %p194_p1 }
  0x11   : > { %p201_p5 = scmp.eq.s32.totalorder %s916_s14, 1  ;;  %s181_s18 = ssub.s32 %s1109_s1, %s1551_s15 }
  0x12   : > { %p919_p6 = scmp.ge.s32.totalorder %s1113_s12, 1  ;;  %p182_p7 = scmp.eq.s32.totalorder %s181_s18, 0 }
  0x13   : > { %p1212_p8 = por %p201_p5, %p200_p3  ;;  %p263_p9 = scmp.lt.s32.totalorder %s1113_s12, 3 }
  0x14   : > { %s1218_s20 = scalar_select %p182_p7, %s1101_s0, %s184_s16  }
  0x15   : > { %p264_p10 = pnand %p919_p6, %p263_p9 }
  0x16   : > { %s1537_s21 = sand.u32 (!%p264_p10), 1, %s1097_s10   ;;  %s307_s22 = sld [smem:[#allocation3 + %s1105_s11]] (!%p264_p10) }
  0x17   : > { %267 = sbr.rel (%p264_p10) target bundleno = 535 (0x217), region = 40  ;;  %s920_s23 = sshll.u32 (!%p264_p10), %s1537_s21, 3 }
  0x18   : > { %s317_s24 = sld [smem:[#allocation3 + %s1105_s11]] (!%p264_p10)  ;;  %s1226_s26 = scalar_lea.vmem (!%p264_p10), [#allocation5], %s920_s23 }
  0x19   : > { %s327_s25 = sld [smem:[#allocation3 + %s1105_s11]] (!%p264_p10) }
  0x1a   : > { %s341_s27 = sld [smem:[#allocation4 + %s1105_s11]] (!%p264_p10) }
  0x1c   : > { %v1117_v0 = vmov 0.0   ;;  %s921_s28 = sshll.u32 %s307_s22, 1 }
  0x1d   : > { %340 = vst [vmem:[%s1226_s26] sm:$0xff] %v1117_v0  ;;  %p309_p11 = scmp.lt.s32.totalorder %s921_s28, 1 }
  0x1e   : > { %s923_s29 = sshll.u32 %s317_s24, 1 }
  0x1f   : > { %p319_p12 = scmp.lt.s32.totalorder %s923_s29, 1  ;;  %s925_s30 = sshll.u32 %s327_s25, 1 }
  0x20   : > { %s1553_s28 = smov (!%p309_p11, %s921_s28), 1  ;;  %p329_p13 = scmp.lt.s32.totalorder %s925_s30, 1 }
  0x21   : > { %s1555_s29 = smov (!%p319_p12, %s923_s29), 1  ;;  %s922_s8 = sshll.u32 %s1553_s28, 3 }
  0x22   : > { %s1233_s16 = scalar_lea.vmem %s1530_s2, %s922_s8  ;;  %s924_s18 = sshll.u32 %s1555_s29, 3 }
  0x23   : > { %s1238_s15 = scalar_lea.vmem %s1531_s3, %s924_s18  ;;  %s1557_s30 = smov (!%p329_p13, %s925_s30), 1 }
  0x24   : > { %s331_s25 = scalar_lea.vmem %s1532_s4, %s1557_s30  ;;  %p926_p0 = scmp.eq.s32.totalorder %s341_s27, 0 }
  0x26   : > { %345 = sbr.rel (%p926_p0) target bundleno = 520 (0x208), region = 48 }
  0x2b   : > { %v347_v1 = vld [vmem:[%s331_s25 + $0x1] sm:$0x1]  ;;  %v346_v2 = vld [vmem:[%s331_s25] sm:$0x1]  ;;  %v391_v3 = vld [vmem:[%s1533_s5 + $0x68] sm:$0xff]  ;;  %v1118_v4 = vmov 0  }
  0x2c   : > { %1008 = vset.pattern.permute.xlu0 %v1118_v4  ;;  %vm349_vm0 = vcmp.gt.f32.partialorder %v347_v1, 0.0  ;;  %vm348_vm1 = vcmp.gt.f32.partialorder %v346_v2, 0.0  ;;  %v1246_v5 = vand.u32 4294901760, %v391_v3  ;;  %v390_v6 = vld [vmem:[%s1533_s5 + $0x60] sm:$0xff]  ;;  %v389_v7 = vld [vmem:[%s1533_s5 + $0x58] sm:$0xff]  ;;  %v388_v8 = vld [vmem:[%s1533_s5 + $0x50] sm:$0xff] }
  0x2d   : > { %v352_v9 = vsel %vm348_vm1, 1, %v1118_v4  ;;  %v1257_v10 = vand.u32 4294901760, %v390_v6  ;;  %v1259_v11 = vand.u32 4294901760, %v389_v7  ;;  %v387_v12 = vld [vmem:[%s1533_s5 + $0x48] sm:$0xff]  ;;  %v386_v13 = vld [vmem:[%s1533_s5 + $0x40] sm:$0xff]  ;;  %v353_v14 = vsel %vm349_vm0, 1, %v1118_v4 }
  0x2e   : > { %v354_v15 = vperm.slane %v352_v9, 0  ;;  %v449_v16 = vsub.f32 %v391_v3, %v1246_v5  ;;  %599 = vmatpush.msra.mxu3 %v1246_v5  ;;  %v1269_v17 = vand.u32 4294901760, %v388_v8  ;;  %402 = vmatpush.msra.mxu0 %v1246_v5  ;;  %v385_v18 = vld [vmem:[%s1533_s5 + $0x38] sm:$0xff]  ;;  %v384_v19 = vld [vmem:[%s1533_s5 + $0x30] sm:$0xff]  ;;  %v1280_v22 = vand.u32 4294901760, %v387_v12  ;;  %v383_v39 = vld [vmem:[%s1533_s5 + $0x28] sm:$0xff] }
  0x2f   : > { %v455_v20 = vsub.f32 %v390_v6, %v1257_v10  ;;  %v461_v21 = vsub.f32 %v389_v7, %v1259_v11  ;;  %v1282_v23 = vand.u32 4294901760, %v386_v13  ;;  %v1287_v26 = vand.u32 4294901760, %v385_v18  ;;  %v382_v44 = vld [vmem:[%s1533_s5 + $0x20] sm:$0xff]  ;;  %v381_v45 = vld [vmem:[%s1533_s5 + $0x18] sm:$0xff]  ;;  %v380_v48 = vld [vmem:[%s1533_s5 + $0x10] sm:$0xff] }
  0x30   : > { %357 = vperm.xlu0 %1008, %v354_v15   ;;  %v1284_v24 = vand.u32 4294901760, %v449_v16  ;;  %545 = vmatpush.msra.mxu2 %v449_v16  ;;  %v467_v25 = vsub.f32 %v388_v8, %v1269_v17  ;;  %v1289_v27 = vand.u32 4294901760, %v384_v19  ;;  %v473_v30 = vsub.f32 %v387_v12, %v1280_v22  ;;  %v379_v55 = vld [vmem:[%s1533_s5 + $0x8] sm:$0xff]  ;;  %v378_v62 = vld [vmem:[%s1533_s5] sm:$0xff] }
  0x31   : > { %v1291_v28 = vand.u32 4294901760, %v455_v20  ;;  %v1293_v29 = vand.u32 4294901760, %v461_v21  ;;  %601 = vmatpush.msra.mxu3 %v1257_v10  ;;  %404 = vmatpush.msra.mxu0 %v1257_v10  ;;  %v479_v31 = vsub.f32 %v386_v13, %v1282_v23  ;;  %v485_v34 = vsub.f32 %v385_v18, %v1287_v26 }
  0x32   : > { %v451_v32 = vsub.f32 %v449_v16, %v1284_v24  ;;  %548 = vmatpush.msra.mxu2 %v455_v20  ;;  %v1300_v33 = vand.u32 4294901760, %v467_v25  ;;  %v1305_v37 = vand.u32 4294901760, %v473_v30  ;;  %v491_v38 = vsub.f32 %v384_v19, %v1289_v27 }
  0x33   : > { %v457_v35 = vsub.f32 %v455_v20, %v1291_v28  ;;  %v463_v36 = vsub.f32 %v461_v21, %v1293_v29  ;;  %603 = vmatpush.msra.mxu3 %v1259_v11  ;;  %406 = vmatpush.msra.mxu0 %v1259_v11  ;;  %v355_v40 = vperm.slane %v353_v14, 0  ;;  %v1314_v43 = vand.u32 4294901760, %v479_v31 }
  0x34   : > { %v452_v41 = vand.u32 4294901760, %v451_v32  ;;  %v469_v42 = vsub.f32 %v467_v25, %v1300_v33  ;;  %551 = vmatpush.msra.mxu2 %v461_v21  ;;  %v1323_v47 = vand.u32 4294901760, %v485_v34  ;;  %v475_v50 = vsub.f32 %v473_v30, %v1305_v37 }
  0x35   : > { %v458_v46 = vand.u32 4294901760, %v457_v35  ;;  %605 = vmatpush.msra.mxu3 %v1269_v17  ;;  %408 = vmatpush.msra.mxu0 %v1269_v17  ;;  %v464_v49 = vand.u32 4294901760, %v463_v36  ;;  %v1330_v51 = vand.u32 4294901760, %v383_v39  ;;  %v1333_v52 = vand.u32 4294901760, %v491_v38 }
  0x36   : > { %453 = vmatpush.msra.mxu1 %v452_v41  ;;  %554 = vmatpush.msra.mxu2 %v467_v25  ;;  %v1336_v53 = vand.u32 4294901760, %v382_v44  ;;  %v1338_v54 = vand.u32 4294901760, %v381_v45  ;;  %v470_v56 = vand.u32 4294901760, %v469_v42  ;;  %v481_v57 = vsub.f32 %v479_v31, %v1314_v43  ;;  %v745_v41 = vld [vmem:[%s1534_s6] sm:$0xff] }
  0x37   : > { %607 = vmatpush.msra.mxu3 %v1280_v22  ;;  %410 = vmatpush.msra.mxu0 %v1280_v22  ;;  %v497_v58 = vsub.f32 %v383_v39, %v1330_v51  ;;  %v1345_v59 = vand.u32 4294901760, %v380_v48  ;;  %v487_v60 = vsub.f32 %v485_v34, %v1323_v47  ;;  %v476_v63 = vand.u32 4294901760, %v475_v50  ;;  %v366_v42 = vld [vmem:[%s1238_s15] sm:$0xff] }
  0x38   : > { %360 = vperm.xlu0 %1008, %v355_v40   ;;  %459 = vmatpush.msra.mxu1 %v458_v46  ;;  %v503_v61 = vsub.f32 %v382_v44, %v1336_v53  ;;  %v509_v1 = vsub.f32 %v381_v45, %v1338_v54  ;;  %v1357_v2 = vand.u32 4294901760, %v379_v55  ;;  %v493_v3 = vsub.f32 %v491_v38, %v1333_v52 }
  0x39   : > { %557 = vmatpush.msra.mxu2 %v473_v30  ;;  %609 = vmatpush.msra.mxu3 %v1282_v23  ;;  %v1353_v0 = vand.u32 4294901760, %v497_v58  ;;  %v482_v4 = vand.u32 4294901760, %v481_v57  ;;  %v515_v7 = vsub.f32 %v380_v48, %v1345_v59  ;;  %v1365_v8 = vand.u32 4294901760, %v378_v62  ;;  %v367_v48 = vld [vmem:[%s1238_s15 + $0x8] sm:$0xff] }
  0x3a   : > { %465 = vmatpush.msra.mxu1 %v464_v49  ;;  %412 = vmatpush.msra.mxu0 %v1282_v23  ;;  %v1361_v6 = vand.u32 4294901760, %v503_v61  ;;  %v488_v9 = vand.u32 4294901760, %v487_v60  ;;  %v1369_v13 = vand.u32 4294901760, %v509_v1  ;;  %v521_v14 = vsub.f32 %v379_v55, %v1357_v2 }
  0x3b   : > { %560 = vmatpush.msra.mxu2 %v479_v31  ;;  %611 = vmatpush.msra.mxu3 %v1287_v26  ;;  %v499_v12 = vsub.f32 %v497_v58, %v1353_v0  ;;  %v494_v15 = vand.u32 4294901760, %v493_v3  ;;  %v1375_v18 = vand.u32 4294901760, %v515_v7  ;;  %v527_v19 = vsub.f32 %v378_v62, %v1365_v8 }
  0x3c   : > { %471 = vmatpush.msra.mxu1 %v470_v56  ;;  %414 = vmatpush.msra.mxu0 %v1287_v26  ;;  %v505_v16 = vsub.f32 %v503_v61, %v1361_v6  ;;  %v511_v21 = vsub.f32 %v509_v1, %v1369_v13  ;;  %v1381_v25 = vand.u32 4294901760, %v521_v14  ;;  %vm392_vm3 = vcmask 916480  }
  0x3d   : > { %563 = vmatpush.msra.mxu2 %v485_v34  ;;  %613 = vmatpush.msra.mxu3 %v1289_v27  ;;  %v500_v20 = vand.u32 4294901760, %v499_v12  ;;  %v517_v31 = vsub.f32 %v515_v7, %v1375_v18  ;;  %v528_v32 = vand.u32 4294901760, %v527_v19  ;;  %vm795_vm5 = vcmask 687104  }
  0x3e   : > { %477 = vmatpush.msra.mxu1 %v476_v63  ;;  %416 = vmatpush.msra.mxu0 %v1289_v27  ;;  %v506_v30 = vand.u32 4294901760, %v505_v16  ;;  %v512_v34 = vand.u32 4294901760, %v511_v21  ;;  %v523_v35 = vsub.f32 %v521_v14, %v1381_v25 }
  0x3f   : > { %566 = vmatpush.msra.mxu2 %v491_v38  ;;  %615 = vmatpush.msra.mxu3 %v1330_v51  ;;  %v518_v36 = vand.u32 4294901760, %v517_v31  ;;  %v529_v38 = vsub.f32 %v527_v19, %v528_v32 }
  0x40   : > { %483 = vmatpush.msra.mxu1 %v482_v4  ;;  %418 = vmatpush.msra.mxu0 %v1330_v51  ;;  %v524_v39 = vand.u32 4294901760, %v523_v35 }
  0x41   : > { %569 = vmatpush.msra.mxu2 %v497_v58  ;;  %617 = vmatpush.msra.mxu3 %v1336_v53  ;;  %v530_v40 = vand.u32 4294901760, %v529_v38 }
  0x42   : > { %489 = vmatpush.msra.mxu1 %v488_v9  ;;  %420 = vmatpush.msra.mxu0 %v1336_v53 }
  0x43   : > { %572 = vmatpush.msra.mxu2 %v503_v61  ;;  %619 = vmatpush.msra.mxu3 %v1338_v54 }
  0x44   : > { %495 = vmatpush.msra.mxu1 %v494_v15  ;;  %422 = vmatpush.msra.mxu0 %v1338_v54  ;;  %v351_v15 = vld [vmem:[%s1233_s16 + $0x8] sm:$0xff] }
  0x45   : > { %575 = vmatpush.msra.mxu2 %v509_v1  ;;  %621 = vmatpush.msra.mxu3 %v1345_v59 }
  0x46   : > { %501 = vmatpush.msra.mxu1 %v500_v20  ;;  %424 = vmatpush.msra.mxu0 %v1345_v59 }
  0x47   : > { %578 = vmatpush.msra.mxu2 %v515_v7  ;;  %623 = vmatpush.msra.mxu3 %v1357_v2 }
  0x48   : > { %507 = vmatpush.msra.mxu1 %v506_v30  ;;  %426 = vmatpush.msra.mxu0 %v1357_v2 }
  0x49   : > { %581 = vmatpush.msra.mxu2 %v521_v14  ;;  %625 = vmatpush.msra.mxu3 %v1365_v8 }
  0x4a   : > { %513 = vmatpush.msra.mxu1 %v512_v34  ;;  %428 = vmatpush.msra.mxu0 %v1365_v8 }
  0x4b   : > { %933 = vmatpush.msrb.mxu3 %v1284_v24  ;;  %584 = vmatpush.msra.mxu2 %v527_v19 }
  0x4c   : > { %519 = vmatpush.msra.mxu1 %v518_v36  ;;  %644 = vmatpush.msrb.mxu0 %v1284_v24  ;;  %v752_v24 = vld [vmem:[%s1534_s6 + $0x38] sm:$0xff] }
  0x4d   : > { %934 = vmatpush.msrb.mxu3 %v1291_v28 }
  0x4e   : > { %525 = vmatpush.msra.mxu1 %v524_v39  ;;  %648 = vmatpush.msrb.mxu0 %v1291_v28  ;;  %v749_v28 = vld [vmem:[%s1534_s6 + $0x20] sm:$0xff] }
  0x4f   : > { %935 = vmatpush.msrb.mxu3 %v1293_v29 }
  0x50   : > { %531 = vmatpush.msra.mxu1 %v530_v40  ;;  %652 = vmatpush.msrb.mxu0 %v1293_v29  ;;  %v748_v29 = vld [vmem:[%s1534_s6 + $0x18] sm:$0xff] }
  0x51   : > { %936 = vmatpush.msrb.mxu3 %v1300_v33 }
  0x52   : > { %709 = vmatpush.msrb.mxu1 %v1246_v5  ;;  %656 = vmatpush.msrb.mxu0 %v1300_v33  ;;  %v758_v5 = vld [vmem:[%s1534_s6 + $0x68] sm:$0xff]  ;;  %v747_v33 = vld [vmem:[%s1534_s6 + $0x10] sm:$0xff] }
  0x53   : > { %937 = vmatpush.msrb.mxu3 %v1305_v37  ;;  %767 = vmatpush.msrb.mxu2 %v758_v5 }
  0x54   : > { %711 = vmatpush.msrb.mxu1 %v1257_v10  ;;  %660 = vmatpush.msrb.mxu0 %v1305_v37  ;;  %v757_v10 = vld [vmem:[%s1534_s6 + $0x60] sm:$0xff]  ;;  %v746_v37 = vld [vmem:[%s1534_s6 + $0x8] sm:$0xff] }
  0x55   : > { %938 = vmatpush.msrb.mxu3 %v1314_v43  ;;  %768 = vmatpush.msrb.mxu2 %v757_v10 }
  0x56   : > { %713 = vmatpush.msrb.mxu1 %v1259_v11  ;;  %664 = vmatpush.msrb.mxu0 %v1314_v43  ;;  %v756_v11 = vld [vmem:[%s1534_s6 + $0x58] sm:$0xff] }
  0x57   : > { %939 = vmatpush.msrb.mxu3 %v1323_v47  ;;  %769 = vmatpush.msrb.mxu2 %v756_v11 }
  0x58   : > { %715 = vmatpush.msrb.mxu1 %v1269_v17  ;;  %668 = vmatpush.msrb.mxu0 %v1323_v47  ;;  %v755_v17 = vld [vmem:[%s1534_s6 + $0x50] sm:$0xff] }
  0x59   : > { %940 = vmatpush.msrb.mxu3 %v1333_v52  ;;  %770 = vmatpush.msrb.mxu2 %v755_v17 }
  0x5a   : > { %717 = vmatpush.msrb.mxu1 %v1280_v22  ;;  %672 = vmatpush.msrb.mxu0 %v1333_v52  ;;  %v754_v22 = vld [vmem:[%s1534_s6 + $0x48] sm:$0xff] }
  0x5b   : > { %941 = vmatpush.msrb.mxu3 %v1353_v0  ;;  %771 = vmatpush.msrb.mxu2 %v754_v22 }
  0x5c   : > { %719 = vmatpush.msrb.mxu1 %v1282_v23  ;;  %676 = vmatpush.msrb.mxu0 %v1353_v0  ;;  %v753_v23 = vld [vmem:[%s1534_s6 + $0x40] sm:$0xff] }
  0x5d   : > { %942 = vmatpush.msrb.mxu3 %v1361_v6  ;;  %772 = vmatpush.msrb.mxu2 %v753_v23 }
  0x5e   : > { %721 = vmatpush.msrb.mxu1 %v1287_v26  ;;  %680 = vmatpush.msrb.mxu0 %v1361_v6  ;;  %v751_v26 = vld [vmem:[%s1534_s6 + $0x30] sm:$0xff] }
  0x5f   : > { %943 = vmatpush.msrb.mxu3 %v1369_v13  ;;  %773 = vmatpush.msrb.mxu2 %v752_v24 }
  0x60   : > { %723 = vmatpush.msrb.mxu1 %v1289_v27  ;;  %684 = vmatpush.msrb.mxu0 %v1369_v13  ;;  %v750_v27 = vld [vmem:[%s1534_s6 + $0x28] sm:$0xff] }
  0x61   : > { %944 = vmatpush.msrb.mxu3 %v1375_v18  ;;  %774 = vmatpush.msrb.mxu2 %v751_v26 }
  0x62   : > { %725 = vmatpush.msrb.mxu1 %v1330_v51  ;;  %688 = vmatpush.msrb.mxu0 %v1375_v18 }
  0x63   : > { %945 = vmatpush.msrb.mxu3 %v1381_v25  ;;  %775 = vmatpush.msrb.mxu2 %v750_v27 }
  0x64   : > { %727 = vmatpush.msrb.mxu1 %v1336_v53  ;;  %692 = vmatpush.msrb.mxu0 %v1381_v25 }
  0x65   : > { %946 = vmatpush.msrb.mxu3 %v528_v32  ;;  %776 = vmatpush.msrb.mxu2 %v749_v28 }
  0x66   : > { %729 = vmatpush.msrb.mxu1 %v1338_v54  ;;  %696 = vmatpush.msrb.mxu0 %v528_v32 }
  0x67   : > { %777 = vmatpush.msrb.mxu2 %v748_v29 }
  0x68   : > { %731 = vmatpush.msrb.mxu1 %v1345_v59 }
  0x69   : > { %778 = vmatpush.msrb.mxu2 %v747_v33 }
  0x6a   : > { %733 = vmatpush.msrb.mxu1 %v1357_v2 }
  0x6b   : > { %779 = vmatpush.msrb.mxu2 %v746_v37 }
  0x6c   : > { %735 = vmatpush.msrb.mxu1 %v1365_v8  ;;  %v350_v8 = vld [vmem:[%s1233_s16] sm:$0xff] }
  0x6d   : > { %780 = vmatpush.msrb.mxu2 %v745_v41 }
  0xa2   : > { %v358_v43 = vpop.permute.xlu0 %357 }
  0xa3   : > { %vm362_vm2 = vcmp.eq.s32.totalorder %v358_v43, 1 }
  0xa4   : > { %v368_v44 = vsel %vm362_vm2, %v366_v42, 0.0  ;;  %v364_v18 = vsel %vm362_vm2, %v350_v8, 0.0 }
  0xa5   : > { %v374_v45 = vperm.slane %v368_v44, 0  ;;  %v370_v21 = vperm.slane %v364_v18, 0 }
  0xa7   : > { %v376_v46 = vsub.f32 %v368_v44, %v374_v45  ;;  %v372_v38 = vsub.f32 %v364_v18, %v370_v21 }
  0xa9   : > { %v394_v47 = vsel %vm392_vm3, %v376_v46, 0 }
  0xaa   : > { %v429_v49 = vand.u32 4294901760, %v394_v47  ;;  %v361_v50 = vpop.permute.xlu0 %360 }
  0xab   : > { %vm363_vm4 = vcmp.eq.s32.totalorder %v361_v50, 1 }
  0xac   : > { %v369_v51 = vsel %vm363_vm4, %v367_v48, 0.0  ;;  %533 = vmatmul.f32.vlgmr.msra.gmra.mxu1 %v429_v49  ;;  %v430_v52 = vsub.f32 %v394_v47, %v429_v49  ;;  %v365_v20 = vsel %vm363_vm4, %v351_v15, 0.0  ;;  %v790_v48 = vld [vmem:[%s1226_s26] sm:$0xff] }
  0xad   : > { %v375_v53 = vperm.slane %v369_v51, 0  ;;  %v371_v31 = vperm.slane %v365_v20, 0 }
  0xae   : > { %587 = vmatmul.f32.vlgmr.msra.gmra.mxu2 %v430_v52  ;;  %v431_v54 = vand.u32 4294901760, %v430_v52 }
  0xaf   : > { %v377_v55 = vsub.f32 %v369_v51, %v375_v53  ;;  %v373_v10 = vsub.f32 %v365_v20, %v371_v31 }
  0xb0   : > { %629 = vmatmul.f32.vlgmr.msra.gmra.mxu3 %v431_v54  ;;  %v432_v56 = vsub.f32 %v430_v52, %v431_v54 }
  0xb1   : > { %v397_v57 = vsel %vm392_vm3, %v377_v55, 0 }
  0xb2   : > { %v437_v58 = vand.u32 4294901760, %v397_v57  ;;  %v433_v59 = vand.u32 4294901760, %v432_v56 }
  0xb4   : > { %434 = vmatmul.f32.vlgmr.msra.gmra.mxu0 %v433_v59  ;;  %537 = vmatmul.f32.gmra.mxu1 %v437_v58  ;;  %v438_v60 = vsub.f32 %v397_v57, %v437_v58 }
  0xb6   : > { %592 = vmatmul.f32.gmra.mxu2 %v438_v60  ;;  %v439_v61 = vand.u32 4294901760, %v438_v60 }
  0xb8   : > { %635 = vmatmul.f32.gmra.mxu3 %v439_v61  ;;  %v440_v62 = vsub.f32 %v438_v60, %v439_v61 }
  0xba   : > { %v441_v63 = vand.u32 4294901760, %v440_v62 }
  0xbc   : > { %442 = vmatmul.f32.gmra.mxu0 %v441_v63  ;;  %737 = vmatmul.f32.vlgmr.msrb.gmra.mxu1 %v429_v49 }
  0xbe   : > { %927 = vmatmul.msk.f32.vlgmr.msrb.gmra.mxu2 %vm392_vm3, %v368_v44 }
  0xc0   : > { %702 = vmatmul.f32.vlgmr.msrb.gmra.mxu3 %v437_v58 }
  0xc4   : > { %698 = vmatmul.f32.vlgmr.msrb.gmra.mxu0 %v429_v49  ;;  %741 = vmatmul.f32.gmra.mxu1 %v437_v58 }
  0xc6   : > { %928 = vmatmul.msk.f32.gmra.mxu2 %vm392_vm3, %v369_v51 }
 0x129   : > { %v534_v0 = vpop.f32.mrf.mxu1 }
 0x131   : > { %v435_v1 = vpop.f32.mrf.mxu0  ;;  %v538_v2 = vpop.f32.mrf.mxu1 }
 0x132   : > { %v588_v3 = vpop.f32.mrf.mxu2  ;;  %v535_v6 = vadd.f32 %v534_v0, %v435_v1 }
 0x133   : > { %v630_v4 = vpop.f32.mrf.mxu3 }
 0x134   : > { %v589_v16 = vadd.f32 %v588_v3, %v535_v6 }
 0x136   : > { %v631_v25 = vadd.f32 %v630_v4, %v589_v16 }
 0x139   : > { %v443_v7 = vpop.f32.mrf.mxu0  ;;  %v738_v13 = vpop.f32.mrf.mxu1 }
 0x13a   : > { %v539_v9 = vadd.f32 %v538_v2, %v443_v7  ;;  %v593_v12 = vpop.f32.mrf.mxu2 }
 0x13b   : > { %v636_v14 = vpop.f32.mrf.mxu3 }
 0x13c   : > { %v594_v19 = vadd.f32 %v593_v12, %v539_v9 }
 0x13e   : > { %v637_v32 = vadd.f32 %v636_v14, %v594_v19 }
 0x141   : > { %v699_v30 = vpop.f32.mrf.mxu0  ;;  %v742_v5 = vpop.f32.mrf.mxu1 }
 0x142   : > { %v700_v34 = vadd.f32 %v699_v30, %v631_v25  ;;  %v782_v35 = vpop.f32.mrf.mxu2 }
 0x143   : > { %v703_v36 = vpop.f32.mrf.mxu3 }
 0x144   : > { %v739_v39 = vadd.f32 %v738_v13, %v700_v34  ;;  %v704_v40 = vadd.f32 %v703_v36, %v637_v32 }
 0x146   : > { %v788_v11 = vsub.f32 %v372_v38, %v739_v39  ;;  %v743_v17 = vadd.f32 %v742_v5, %v704_v40 }
 0x148   : > { %v791_v22 = vmul.f32 %v788_v11, %v782_v35  ;;  %v789_v23 = vsub.f32 %v373_v10, %v743_v17 }
 0x14a   : > { %v785_v24 = vpop.f32.mrf.mxu2  ;;  %v793_v26 = vmul.f32 %v791_v22, %v788_v11 }
 0x14b   : > { %v792_v27 = vmul.f32 %v789_v23, %v785_v24 }
 0x14c   : > { %v796_v29 = vsel %vm795_vm5, %v793_v26, 0.0 }
 0x14d   : > { %v794_v28 = vmul.f32 %v792_v27, %v789_v23 }
 0x14f   : > { %v797_v33 = vsel %vm795_vm5, %v794_v28, 0.0 }
 0x150   : > { %v798_v37 = vadd.f32 %v797_v33, %v796_v29 }
 0x152   : > { %799 = vadd.xlane.f32.xlu1 %v798_v37 }
 0x1c5   : > { %v800_v41 = vpop.xlane.xlu1 %799 }
 0x1c6   : > { %v801_v42 = vrot.slane %v800_v41, 4 }
 0x1c8   : > { %v802_v43 = vadd.f32 %v801_v42, %v800_v41 }
 0x1ca   : > { %v803_v44 = vrot.slane %v802_v43, 2 }
 0x1cc   : > { %v804_v45 = vadd.f32 %v803_v44, %v802_v43 }
 0x1ce   : > { %v805_v46 = vrot.slane %v804_v45, 1 }
 0x1d0   : > { %v806_v47 = vadd.f32 %v805_v46, %v804_v45 }
 0x1d2   : > { %947 = vpush %v806_v47 }
 0x203   : > { %s948_s15 = spop %947 }
 0x204   : > { %v808_v49 = vstv %s948_s15 }
 0x205   : > { %v809_v50 = vadd.f32 %v808_v49, %v790_v48 }
 0x207   : > { %810 = vst [vmem:[%s1226_s26] sm:$0xff] %v809_v50 }
 0x208 PF: > { %s930_s16 = sshll.u32 %s1105_s11, 3  ;;  %s824_s29 = sshll.u32 %s1226_s26, 4  ;;  %s825_s29 = int_to_ptr.vmem [resolvable:$true] %s824_s29 }
 0x209   : > { %s822_s21 = scalar_lea.hbm %s1535_s7, %s930_s16  ;;  %s1544_s30 = sand.u32 1, %s1097_s10  }
 0x20a   : > { %s826_s8 = sshll.u32 %s822_s21, 4  ;;  %s812_s27 = scalar_lea.sflag [#allocation6], %s1544_s30  ;;  %s827_s8 = int_to_ptr.hbm [resolvable:$true] %s826_s8 }
 0x20b   : > { %s1047_s13 = sshra.s32 %s827_s8, 4  ;;  %s1053_s11 = scalar_lea.hbm %s1535_s7, 16  ;;  %s1048_s13 = int_to_ptr.hbm [resolvable:$true] %s1047_s13 }
 0x20c   : > { %s1049_s1 = scalar_lea.hbm %s1048_s13, 8  ;;  %p1054_p5 = scmp.lt.s32.totalorder %s1048_s13, %s1535_s7 }
 0x20d   : > { %p1050_p1 = scmp.ne.s32.totalorder %s1048_s13, %s1049_s1  ;;  %p1055_p6 = scmp.lt.s32.totalorder %s1053_s11, %s1049_s1 }
 0x20f   : > { %p1051_p2 = pnand %p1050_p1, %p1205_p4  ;;  %p1056_p7 = por %p1055_p6, %p1054_p5 }
 0x211   : > { %p1052_p3 = pneg %p1051_p2 }
 0x213   : > { %p1057_p9 = pnand %p1056_p7, %p1052_p3 }
 0x215   : > { %1060 = shalt.err (!%p1057_p9)
}
 0x216   : > { %949 = dma.vmem_to_hbm [thread:$0]  (%p1205_p4), %s825_s29, 128, %s827_s8, %s812_s27  }
 0x217 PF: > { %p955_p10 = scmp.ge.s32.totalorder %s1113_s12, 2  ;;  %s838_s26 = sand.u32 1, %s1093_s9  }
 0x218   : > { %s839_s24 = scalar_lea.sflag [#allocation6], %s838_s26 }
 0x219   : > { %p952_p11 = pnand %p955_p10, %p1212_p8 }
 0x21b   : > { %p953_p12 = pneg %p952_p11 }
 0x21d   : > { %1088 = dma.done.wait (%p953_p12), %s839_s24, 128  }
 0x21e   : > { %1090 = vsyncadd (%p953_p12), %s839_s24, 4294967168  ;;  %s33_s12 = sadd.s32 1, %s1113_s12   ;;  %s1545_s11 = sld [smem:[#allocation9_spill]] }
 0x21f   : > { %p30_p13 = scmp.ge.s32.totalorder %s33_s12, 4   ;;  %s1546_s1 = sld [smem:[#allocation10_spill]] }
 0x220   : > { %s1547_s9 = smov %s1097_s10  ;;  %s1548_s10 = smov %s1101_s0 }
 0x221   : > { %s1549_s0 = smov %s1218_s20  ;;  %32 = sbr.rel (!%p30_p13) target bundleno = 11 (0xb), region = 89 }
 0x226   :  { %845 = vsyncpa [#allocation6], 1 }
 0x227   :  { %847 = vsyncpa [#allocation6 + $0x1], 1 }

</bundles_post_ra>
